<compile_context>
chip_gen: v7x
topology: tpu7x:2x2x1
jax: 0.10.0
libtpu: 0.0.40
codegen_flags: <defaults>
</compile_context>

<pallas_src>
import jax
import jax.numpy as jnp
from jax.experimental import pallas as pl
from jax.experimental.pallas import tpu as pltpu


NEG_SLOPE = 0.01  # nn.LeakyReLU() default negative_slope


def _leaky_relu(x):
    return jnp.where(x > 0, x, NEG_SLOPE * x)


def _round_up(n, m):
    return ((n + m - 1) // m) * m


def mlp_kernel(x_ref, w1_ref, b1_ref, w2_ref, b2_ref, w3_ref, b3_ref, o_ref):
    # One (TM, in_dim) row-tile per grid step; weights stay resident in VMEM.
    x = x_ref[...]  # bf16 (TM, 64)

    h1 = jnp.dot(x, w1_ref[...], preferred_element_type=jnp.float32) + b1_ref[...]
    h1 = _leaky_relu(h1).astype(jnp.bfloat16)  # (TM, 512)

    h2 = jnp.dot(h1, w2_ref[...], preferred_element_type=jnp.float32) + b2_ref[...]
    h2 = _leaky_relu(h2).astype(jnp.bfloat16)  # (TM, 128)

    o_ref[...] = (
        jnp.dot(h2, w3_ref[...], preferred_element_type=jnp.float32) + b3_ref[...]
    )  # f32 (TM, 2)


def linear_net_mul_forward(x, params, *, block_rows=512):
    """Fused forward pass. x: (B, in_dim) float32; params already prepared
    (bf16 weights, f32 biases, hidden dim padded to 512)."""
    w1, b1, w2, b2, w3, b3 = params
    B, in_dim = x.shape
    h1_dim = w1.shape[1]
    h2_dim = w2.shape[1]
    out_dim = w3.shape[1]

    # Row tile: multiple of 8 (sublanes); cap at block_rows for VMEM bounds.
    tm = min(block_rows, _round_up(B, 8))
    b_pad = _round_up(B, tm)
    if b_pad != B:
        x = jnp.pad(x, ((0, b_pad - B), (0, 0)))
    x = x.astype(jnp.bfloat16)

    grid = (b_pad // tm,)

    cost = pl.CostEstimate(
        flops=2 * b_pad * (in_dim * h1_dim + h1_dim * h2_dim + h2_dim * out_dim),
        transcendentals=0,
        bytes_accessed=(
            b_pad * in_dim * 2                      # x stream (bf16)
            + (w1.size + w2.size + w3.size) * 2     # bf16 weights (resident)
            + (b1.size + b2.size + b3.size) * 4     # f32 biases
            + b_pad * out_dim * 4                   # f32 output
        ),
    )

    out = pl.pallas_call(
        mlp_kernel,
        out_shape=jax.ShapeDtypeStruct((b_pad, out_dim), jnp.float32),
        grid_spec=pltpu.PrefetchScalarGridSpec(
            num_scalar_prefetch=0,
            grid=grid,
            in_specs=[
                pl.BlockSpec((tm, in_dim), lambda i: (i, 0)),     # x: streamed
                pl.BlockSpec(w1.shape, lambda i: (0, 0)),         # weights/biases:
                pl.BlockSpec(b1.shape, lambda i: (0, 0)),         #   resident
                pl.BlockSpec(w2.shape, lambda i: (0, 0)),
                pl.BlockSpec(b2.shape, lambda i: (0, 0)),
                pl.BlockSpec(w3.shape, lambda i: (0, 0)),
                pl.BlockSpec(b3.shape, lambda i: (0, 0)),
            ],
            out_specs=pl.BlockSpec((tm, out_dim), lambda i: (i, 0)),
        ),
        compiler_params=pltpu.CompilerParams(
            dimension_semantics=("parallel",),
        ),
        cost_estimate=cost,
    )(x, w1, b1, w2, b2, w3, b3)
    return out[:B]


def init_params(key, in_dim=64, n_hidden_1=500, n_hidden_2=128, out_dim=2):
    """Deterministic synthetic init mimicking PyTorch Linear's uniform ranges.
    Returns f32 params at the *logical* (unpadded) sizes."""
    ks = jax.random.split(key, 6)

    def _layer(kw, kb, fan_in, fan_out):
        bound = 1.0 / jnp.sqrt(float(fan_in))
        w = jax.random.uniform(kw, (fan_in, fan_out), jnp.float32, -bound, bound)
        b = jax.random.uniform(kb, (1, fan_out), jnp.float32, -bound, bound)
        return w, b

    w1, b1 = _layer(ks[0], ks[1], in_dim, n_hidden_1)
    w2, b2 = _layer(ks[2], ks[3], n_hidden_1, n_hidden_2)
    w3, b3 = _layer(ks[4], ks[5], n_hidden_2, out_dim)
    return (w1, b1, w2, b2, w3, b3)


def prepare_params(params, hidden_pad=512):
    """Pad hidden dim 500 -> 512 with zeros and cast weights to bf16
    (biases stay f32; zero-padding is mathematically a no-op)."""
    w1, b1, w2, b2, w3, b3 = params
    h1 = w1.shape[1]
    pad = hidden_pad - h1
    if pad > 0:
        w1 = jnp.pad(w1, ((0, 0), (0, pad)))   # extra output columns = 0
        b1 = jnp.pad(b1, ((0, 0), (0, pad)))   # extra biases = 0
        w2 = jnp.pad(w2, ((0, pad), (0, 0)))   # extra input rows = 0
    return (
        w1.astype(jnp.bfloat16), b1.astype(jnp.float32),
        w2.astype(jnp.bfloat16), b2.astype(jnp.float32),
        w3.astype(jnp.bfloat16), b3.astype(jnp.float32),
    )


def _reference_forward(x, params):
    """Pure-JAX f32 reference on the original (unpadded) params."""
    w1, b1, w2, b2, w3, b3 = params
    h1 = _leaky_relu(x @ w1 + b1)
    h2 = _leaky_relu(h1 @ w2 + b2)
    return h2 @ w3 + b3


if __name__ == "__main__":
    key = jax.random.PRNGKey(0)
    k_params, k_x = jax.random.split(key)

    B, in_dim = 8, 64
    params_f32 = init_params(k_params, in_dim=in_dim, n_hidden_1=500,
                             n_hidden_2=128, out_dim=2)
    params = prepare_params(params_f32, hidden_pad=512)
    x = jax.random.normal(k_x, (B, in_dim), dtype=jnp.float32)

    out = linear_net_mul_forward(x, params)
    out = jax.block_until_ready(out)

    # PyTorch forward raises ValueError on NaN input; check off the launch
    # critical path (after the kernel result is ready) to avoid a blocking
    # host sync before the launch.
    if bool(jnp.any(jnp.isnan(x))):
        raise ValueError()

    ref = _reference_forward(x, params_f32)
    assert out.shape == (B, 2)
    # bf16 operands (f32 accumulation) -> looser tolerance than pure f32.
    assert jnp.allclose(out, ref, atol=5e-2, rtol=5e-2)

    print("KERNEL_OK")
</pallas_src>

<mosaic_0001>
module attributes {stable_mosaic.version = 11 : i64} {
  func.func @mlp_kernel(%arg0: i32, %arg1: memref<8x64xbf16, #tpu.memory_space<vmem>>, %arg2: memref<64x512xbf16, #tpu.memory_space<vmem>>, %arg3: memref<1x512xf32, #tpu.memory_space<vmem>>, %arg4: memref<512x128xbf16, #tpu.memory_space<vmem>>, %arg5: memref<1x128xf32, #tpu.memory_space<vmem>>, %arg6: memref<128x2xbf16, #tpu.memory_space<vmem>>, %arg7: memref<1x2xf32, #tpu.memory_space<vmem>>, %arg8: memref<8x2xf32, #tpu.memory_space<vmem>>) attributes {dimension_semantics = [#tpu.dimension_semantics<parallel>], iteration_bounds = array<i64: 1>, scalar_prefetch = 0 : i64, scratch_operands = 0 : i64, tpu.core_type = #tpu.core_type<tc>, window_params = [{transform_indices = @transform_0, window_bounds = array<i64: 8, 64>}, {pipeline_mode = #tpu.pipeline_mode<synchronous>, transform_indices = @transform_1, window_bounds = array<i64: 64, 512>}, {pipeline_mode = #tpu.pipeline_mode<synchronous>, transform_indices = @transform_2, window_bounds = array<i64: 1, 512>}, {pipeline_mode = #tpu.pipeline_mode<synchronous>, transform_indices = @transform_3, window_bounds = array<i64: 512, 128>}, {pipeline_mode = #tpu.pipeline_mode<synchronous>, transform_indices = @transform_4, window_bounds = array<i64: 1, 128>}, {pipeline_mode = #tpu.pipeline_mode<synchronous>, transform_indices = @transform_5, window_bounds = array<i64: 128, 2>}, {pipeline_mode = #tpu.pipeline_mode<synchronous>, transform_indices = @transform_6, window_bounds = array<i64: 1, 2>}, {transform_indices = @transform_7, window_bounds = array<i64: 8, 2>}]} {
    %c0 = arith.constant 0 : index
    %c0_0 = arith.constant 0 : index
    %0 = vector.load %arg1[%c0, %c0_0] : memref<8x64xbf16, #tpu.memory_space<vmem>>, vector<8x64xbf16>
    %c0_1 = arith.constant 0 : index
    %c0_2 = arith.constant 0 : index
    %1 = vector.load %arg2[%c0_1, %c0_2] : memref<64x512xbf16, #tpu.memory_space<vmem>>, vector<64x512xbf16>
    %cst = arith.constant dense<0.000000e+00> : vector<8x512xf32>
    %2 = tpu.matmul %0, %1, %cst {dimension_numbers = #tpu.dot_dimension_numbers<[1], [0], [0], [1], [0, 0, 1, 1], [], []>} : vector<8x64xbf16>, vector<64x512xbf16>, vector<8x512xf32> -> vector<8x512xf32>
    %c0_3 = arith.constant 0 : index
    %c0_4 = arith.constant 0 : index
    %3 = vector.load %arg3[%c0_3, %c0_4] : memref<1x512xf32, #tpu.memory_space<vmem>>, vector<1x512xf32>
    %4 = vector.broadcast %3 : vector<1x512xf32> to vector<8x512xf32>
    %5 = arith.addf %2, %4 : vector<8x512xf32>
    %cst_5 = arith.constant 0.000000e+00 : f32
    %6 = vector.broadcast %cst_5 : f32 to vector<8x512xf32>
    %7 = arith.cmpf ogt, %5, %6 : vector<8x512xf32>
    %cst_6 = arith.constant 0.00999999977 : f32
    %8 = vector.broadcast %cst_6 : f32 to vector<8x512xf32>
    %9 = arith.mulf %8, %5 : vector<8x512xf32>
    %10 = arith.select %7, %5, %9 : vector<8x512xi1>, vector<8x512xf32>
    %11 = arith.truncf %10 : vector<8x512xf32> to vector<8x512xbf16>
    %c0_7 = arith.constant 0 : index
    %c0_8 = arith.constant 0 : index
    %12 = vector.load %arg4[%c0_7, %c0_8] : memref<512x128xbf16, #tpu.memory_space<vmem>>, vector<512x128xbf16>
    %cst_9 = arith.constant dense<0.000000e+00> : vector<8x128xf32>
    %13 = tpu.matmul %11, %12, %cst_9 {dimension_numbers = #tpu.dot_dimension_numbers<[1], [0], [0], [1], [0, 0, 1, 1], [], []>} : vector<8x512xbf16>, vector<512x128xbf16>, vector<8x128xf32> -> vector<8x128xf32>
    %c0_10 = arith.constant 0 : index
    %c0_11 = arith.constant 0 : index
    %14 = vector.load %arg5[%c0_10, %c0_11] : memref<1x128xf32, #tpu.memory_space<vmem>>, vector<1x128xf32>
    %15 = vector.broadcast %14 : vector<1x128xf32> to vector<8x128xf32>
    %16 = arith.addf %13, %15 : vector<8x128xf32>
    %cst_12 = arith.constant 0.000000e+00 : f32
    %17 = vector.broadcast %cst_12 : f32 to vector<8x128xf32>
    %18 = arith.cmpf ogt, %16, %17 : vector<8x128xf32>
    %cst_13 = arith.constant 0.00999999977 : f32
    %19 = vector.broadcast %cst_13 : f32 to vector<8x128xf32>
    %20 = arith.mulf %19, %16 : vector<8x128xf32>
    %21 = arith.select %18, %16, %20 : vector<8x128xi1>, vector<8x128xf32>
    %22 = arith.truncf %21 : vector<8x128xf32> to vector<8x128xbf16>
    %c0_14 = arith.constant 0 : index
    %c0_15 = arith.constant 0 : index
    %23 = vector.load %arg6[%c0_14, %c0_15] : memref<128x2xbf16, #tpu.memory_space<vmem>>, vector<128x2xbf16>
    %cst_16 = arith.constant dense<0.000000e+00> : vector<8x2xf32>
    %24 = tpu.matmul %22, %23, %cst_16 {dimension_numbers = #tpu.dot_dimension_numbers<[1], [0], [0], [1], [0, 0, 1, 1], [], []>} : vector<8x128xbf16>, vector<128x2xbf16>, vector<8x2xf32> -> vector<8x2xf32>
    %c0_17 = arith.constant 0 : index
    %c0_18 = arith.constant 0 : index
    %25 = vector.load %arg7[%c0_17, %c0_18] : memref<1x2xf32, #tpu.memory_space<vmem>>, vector<1x2xf32>
    %26 = vector.broadcast %25 : vector<1x2xf32> to vector<8x2xf32>
    %27 = arith.addf %24, %26 : vector<8x2xf32>
    %c0_19 = arith.constant 0 : index
    %c0_20 = arith.constant 0 : index
    %28 = vector.load %arg8[%c0_19, %c0_20] : memref<8x2xf32, #tpu.memory_space<vmem>>, vector<8x2xf32>
    tpu.vector_store %arg8[%c0_19, %c0_20], %27 {strides = array<i32>} : memref<8x2xf32, #tpu.memory_space<vmem>>, vector<8x2xf32>,
    return
  }
  func.func @transform_0(%arg0: i32) -> (i32, i32) {
    %c0_i32 = arith.constant 0 : i32
    %c0_i32_0 = arith.constant 0 : i32
    return %arg0, %c0_i32 : i32, i32
  }
  func.func @transform_1(%arg0: i32) -> (i32, i32) {
    %c0_i32 = arith.constant 0 : i32
    %c0_i32_0 = arith.constant 0 : i32
    %c0_i32_1 = arith.constant 0 : i32
    return %c0_i32, %c0_i32_0 : i32, i32
  }
  func.func @transform_2(%arg0: i32) -> (i32, i32) {
    %c0_i32 = arith.constant 0 : i32
    %c0_i32_0 = arith.constant 0 : i32
    %c0_i32_1 = arith.constant 0 : i32
    return %c0_i32, %c0_i32_0 : i32, i32
  }
  func.func @transform_3(%arg0: i32) -> (i32, i32) {
    %c0_i32 = arith.constant 0 : i32
    %c0_i32_0 = arith.constant 0 : i32
    %c0_i32_1 = arith.constant 0 : i32
    return %c0_i32, %c0_i32_0 : i32, i32
  }
  func.func @transform_4(%arg0: i32) -> (i32, i32) {
    %c0_i32 = arith.constant 0 : i32
    %c0_i32_0 = arith.constant 0 : i32
    %c0_i32_1 = arith.constant 0 : i32
    return %c0_i32, %c0_i32_0 : i32, i32
  }
  func.func @transform_5(%arg0: i32) -> (i32, i32) {
    %c0_i32 = arith.constant 0 : i32
    %c0_i32_0 = arith.constant 0 : i32
    %c0_i32_1 = arith.constant 0 : i32
    return %c0_i32, %c0_i32_0 : i32, i32
  }
  func.func @transform_6(%arg0: i32) -> (i32, i32) {
    %c0_i32 = arith.constant 0 : i32
    %c0_i32_0 = arith.constant 0 : i32
    %c0_i32_1 = arith.constant 0 : i32
    return %c0_i32, %c0_i32_0 : i32, i32
  }
  func.func @transform_7(%arg0: i32) -> (i32, i32) {
    %c0_i32 = arith.constant 0 : i32
    %c0_i32_0 = arith.constant 0 : i32
    return %arg0, %c0_i32 : i32, i32
  }
}

</mosaic_0001>

<bundles_post_ra>
// kernel: tpu_custom_call.1
= control target key start
LH: loop header
LB: loop body
LE: loop exit
PB: predicated region body
PF: predicated region fallthrough
CT: control target
= control target key end

     0   :  { %12 = vsyncpa [#allocation3], 0  ;;  %s1119_s0 = inlined_call_operand.vmem [shape: bf16[8,64], index: 0, kind: input, shape index: {}]   ;;  %s1120_s1 = inlined_call_operand.hbm [shape: bf16[64,512], index: 1, kind: input, shape index: {}]   ;;  %s1121_s2 = inlined_call_operand.vmem [shape: f32[1,512], index: 2, kind: input, shape index: {}]   ;;  %s1122_s3 = inlined_call_operand.hbm [shape: bf16[512,128], index: 3, kind: input, shape index: {}]   ;;  %s1123_s4 = inlined_call_operand.vmem [shape: f32[1,128], index: 4, kind: input, shape index: {}]   ;;  %s1124_s5 = inlined_call_operand.vmem [shape: bf16[128,2], index: 5, kind: input, shape index: {}]   ;;  %s1125_s6 = inlined_call_operand.vmem [shape: f32[1,2], index: 6, kind: input, shape index: {}]   ;;  %s1126_s7 = inlined_call_operand.vmem [shape: f32[8,2], index: 7, kind: output, shape index: {}]  }
   0x1   :  { %13 = vsyncpa [#allocation5], 0  ;;  %s996_s24 = smov [#allocation2]   ;;  %s948_s28 = scalar_lea.hbm %s1120_s1, 2048 }
   0x2   :  { %s21_s25 = sshll.u32 %s996_s24, 4  ;;  %p949_p0 = scmp.ne.s32.totalorder %s1120_s1, %s948_s28  ;;  %s22_s25 = int_to_ptr.vmem [resolvable:$true] %s21_s25 }
   0x3   :  { %p952_p1 = scmp.lt.u32.totalorder %s948_s28, %s1120_s1 }
   0x5   :  { %p954_p2 = pnand %p952_p1, %p949_p0 }
   0x7   :  { %957 = shalt.err (!%p954_p2)
}
   0x8   :  { %s958_s10 = scalar_lea.vmem %s22_s25, 2048  ;;  %p963_p4 = scmp.lt.s32.totalorder %s22_s25, %s22_s25 }
   0x9   :  { %p959_p3 = scmp.ne.s32.totalorder %s22_s25, %s958_s10  ;;  %p964_p5 = scmp.lt.s32.totalorder %s958_s10, %s958_s10 }
   0xb   :  { %p965_p6 = por %p964_p5, %p963_p4 }
   0xd   :  { %p966_p7 = pnand %p965_p6, %p959_p3 }
   0xf   :  { %969 = shalt.err (!%p966_p7)
}
  0x10   :  { %s997_s11 = smov 256   ;;  %s998_s12 = smov 16  }
  0x11   :  { %27 = dma.hbm_to_vmem [thread:$0]  %s1120_s1, 2048, %s22_s25, [#allocation3], %s997_s11, %s997_s11, %s998_s12  }
  0x12   :  { %s999_s15 = smov [#allocation4]   ;;  %s970_s19 = scalar_lea.hbm %s1122_s3, 4096 }
  0x13   :  { %s35_s16 = sshll.u32 %s999_s15, 4  ;;  %p971_p8 = scmp.ne.s32.totalorder %s1122_s3, %s970_s19  ;;  %s36_s16 = int_to_ptr.vmem [resolvable:$true] %s35_s16 }
  0x14   :  { %p974_p9 = scmp.lt.u32.totalorder %s970_s19, %s1122_s3 }
  0x16   :  { %p976_p10 = pnand %p974_p9, %p971_p8 }
  0x18   :  { %979 = shalt.err (!%p976_p10)
}
  0x19   :  { %s980_s24 = scalar_lea.vmem %s36_s16, 4096  ;;  %p985_p12 = scmp.lt.s32.totalorder %s36_s16, %s36_s16 }
  0x1a   :  { %p981_p11 = scmp.ne.s32.totalorder %s36_s16, %s980_s24  ;;  %p986_p13 = scmp.lt.s32.totalorder %s980_s24, %s980_s24 }
  0x1c   :  { %p987_p0 = por %p986_p13, %p985_p12 }
  0x1e   :  { %p988_p1 = pnand %p987_p0, %p981_p11 }
  0x20   :  { %991 = shalt.err (!%p988_p1)
}
  0x21   :  { %s1000_s1 = smov 64   ;;  %s1001_s25 = smov 4  }
  0x22   :  { %41 = dma.hbm_to_vmem [thread:$0]  %s1122_s3, 4096, %s36_s16, [#allocation5], %s1000_s1, %s1000_s1, %s1001_s25  }
  0x23   :  { %992 = dma.done.wait [#allocation3], 2048  }
  0x24   :  { %993 = vsyncadd [#allocation3], 4294965248 }
  0x25   :  { %994 = dma.done.wait [#allocation5], 4096  }
  0x26   :  { %995 = vsyncadd [#allocation5], 4294963200  ;;  %v1002_v0 = vmov 0   ;;  %v884_v1 = vld [vmem:[#allocation2 + $0x4] ss:$16 sps:$4 sm:$0xff]   ;;  %v910_v14 = vld [vmem:[#allocation4 + $0x48] sm:$0xff]   ;;  %v74_v51 = vlaneseq }
  0x27   :  { %210 = vmatprep.mubr.bf16.mxu1 %v1002_v0  ;;  %v886_v2 = vld [vmem:[#allocation2] ss:$16 sps:$4 sm:$0xff]   ;;  %178 = vmatprep.subr.bf16.mxu1 %v884_v1  ;;  %v887_v3 = vld [vmem:[#allocation2 + $0x24] ss:$16 sps:$4 sm:$0xff]   ;;  %v898_v9 = vld [vmem:[#allocation2 + $0xc] ss:$16 sps:$4 sm:$0xff]  }
  0x28   :  { %179 = vmatpush1.bf16.msra.mxu1 %v886_v2  ;;  %v889_v4 = vld [vmem:[#allocation2 + $0x20] ss:$16 sps:$4 sm:$0xff]   ;;  %v890_v5 = vld [vmem:[#allocation2 + $0x44] ss:$16 sps:$4 sm:$0xff]   ;;  %v896_v13 = vld [vmem:[#allocation2 + $0x8] ss:$16 sps:$4 sm:$0xff]  }
  0x29   :  { %180 = vmatprep.subr.bf16.mxu1 %v887_v3  ;;  %v892_v6 = vld [vmem:[#allocation2 + $0x40] ss:$16 sps:$4 sm:$0xff]   ;;  %v893_v7 = vld [vmem:[#allocation2 + $0x64] ss:$16 sps:$4 sm:$0xff]   ;;  %vm174_vm0 = vcmask 523264   ;;  %v911_v15 = vld [vmem:[#allocation4 + $0x8] sm:$0xff]  }
  0x2a   :  { %v895_v8 = vld [vmem:[#allocation2 + $0x60] ss:$16 sps:$4 sm:$0xff]   ;;  %v901_v16 = vld [vmem:[#allocation2 + $0x2c] ss:$16 sps:$4 sm:$0xff]   ;;  %v899_v18 = vld [vmem:[#allocation2 + $0x28] ss:$16 sps:$4 sm:$0xff]  }
  0x2b   :  { %v908_v10 = vld [vmem:[#allocation4 + $0x40] sm:$0xff]   ;;  %v912_v17 = vld [vmem:[#allocation4 + $0x50] sm:$0xff]   ;;  %v914_v20 = vld [vmem:[#allocation4 + $0x58] sm:$0xff]   ;;  %v1003_v50 = vmov 0.0   ;;  %v75_v52 = vshrl.u32 %v74_v51, 7  ;;  %vm1004_vm5 = vmmov 0  }
  0x2c   :  { %181 = vmatpush1.bf16.msra.mxu1 %v889_v4  ;;  %v909_v11 = vld [vmem:[#allocation4] sm:$0xff]   ;;  %802 = vmatprep.subr.bf16.mxu0 %v908_v10  ;;  %v913_v19 = vld [vmem:[#allocation4 + $0x10] sm:$0xff]   ;;  %v904_v21 = vld [vmem:[#allocation2 + $0x4c] ss:$16 sps:$4 sm:$0xff]   ;;  %vm734_vm7 = vcmask 15360  }
  0x2d   :  { %182 = vmatprep.subr.bf16.mxu1 %v890_v5  ;;  %v55_v12 = vld [vmem:[%s1119_s0] sm:$0xf]  ;;  %803 = vmatpush3.bf16.msra.mxu0 %v909_v11  ;;  %v902_v22 = vld [vmem:[#allocation2 + $0x48] ss:$16 sps:$4 sm:$0xff]   ;;  %v907_v25 = vld [vmem:[#allocation2 + $0x6c] ss:$16 sps:$4 sm:$0xff]  }
  0x2e   :  { %804 = vmatprep.subr.bf16.mxu0 %v910_v14  ;;  %v915_v23 = vld [vmem:[#allocation4 + $0x18] sm:$0xff]   ;;  %v916_v24 = vld [vmem:[#allocation4 + $0x60] sm:$0xff]   ;;  %v920_v29 = vld [vmem:[#allocation4 + $0x68] sm:$0xff]   ;;  %v76_v53 = vsub.s32 0, %v75_v52  ;;  %v80_v55 = vsub.s32 1, %v75_v52 }
  0x2f   :  { %v905_v26 = vld [vmem:[#allocation2 + $0x68] ss:$16 sps:$4 sm:$0xff]   ;;  %v917_v27 = vld [vmem:[#allocation4 + $0xc0] sm:$0xff]   ;;  %v924_v34 = vld [vmem:[#allocation4 + $0x70] sm:$0xff]  }
  0x30   :  { %183 = vmatpush1.bf16.msra.mxu1 %v892_v6  ;;  %v918_v28 = vld [vmem:[#allocation4 + $0x20] sm:$0xff]   ;;  %v922_v30 = vld [vmem:[#allocation4 + $0x28] sm:$0xff]   ;;  %v925_v35 = vld [vmem:[#allocation4 + $0xd0] sm:$0xff]  }
  0x31   :  { %184 = vmatprep.subr.bf16.mxu1 %v893_v7  ;;  %805 = vmatpush3.bf16.msra.mxu0 %v911_v15  ;;  %v919_v31 = vld [vmem:[#allocation4 + $0x80] sm:$0xff]   ;;  %v921_v32 = vld [vmem:[#allocation4 + $0xc8] sm:$0xff]   ;;  %v926_v36 = vld [vmem:[#allocation4 + $0x30] sm:$0xff]   ;;  %v84_v7 = vsub.s32 2, %v75_v52 }
  0x32   :  { %806 = vmatprep.subr.bf16.mxu0 %v912_v17  ;;  %v923_v33 = vld [vmem:[#allocation4 + $0x88] sm:$0xff]   ;;  %v927_v37 = vld [vmem:[#allocation4 + $0x90] sm:$0xff]   ;;  %v928_v38 = vld [vmem:[#allocation4 + $0x78] sm:$0xff]  }
  0x33   :  { %v929_v39 = vld [vmem:[#allocation4 + $0xd8] sm:$0xff]   ;;  %v932_v42 = vld [vmem:[#allocation4 + $0xe0] sm:$0xff]   ;;  %v934_v44 = vld [vmem:[#allocation4 + $0xe8] sm:$0xff]  }
  0x34   :  { %185 = vmatpush1.bf16.msra.mxu1 %v895_v8  ;;  %v930_v40 = vld [vmem:[#allocation4 + $0x38] sm:$0xff]   ;;  %v933_v43 = vld [vmem:[#allocation4 + $0xa0] sm:$0xff]   ;;  %v935_v45 = vld [vmem:[#allocation4 + $0xa8] sm:$0xff]   ;;  %v88_v8 = vsub.s32 3, %v75_v52 }
  0x35   :  { %219 = vmatprep.subr.bf16.mxu1 %v898_v9  ;;  %807 = vmatpush3.bf16.msra.mxu0 %v913_v19  ;;  %v931_v41 = vld [vmem:[#allocation4 + $0x98] sm:$0xff]   ;;  %v936_v46 = vld [vmem:[#allocation4 + $0xf0] sm:$0xff]   ;;  %v72_v54 = vld [vmem:[%s1121_s2] sm:$0xf] }
  0x36   :  { %808 = vmatprep.subr.bf16.mxu0 %v914_v20  ;;  %v937_v47 = vld [vmem:[#allocation4 + $0xb0] sm:$0xff]   ;;  %v938_v48 = vld [vmem:[#allocation4 + $0xf8] sm:$0xff]   ;;  %v77_v56 = vrot.slane %v72_v54, %v76_v53  ;;  %v81_v57 = vrot.slane %v72_v54, %v80_v55  ;;  %v940_v5 = vld [vmem:[%s1124_s5] sm:$0xff]   ;;  %v85_v9 = vrot.slane %v72_v54, %v84_v7  ;;  %v89_v10 = vrot.slane %v72_v54, %v88_v8 }
  0x37   :  { %758 = vmatmul.mubr.msk.bf16.vlgmr.msra.gmra.mrb[0].mxu1 %vm174_vm0, %v55_v12  ;;  %v939_v49 = vld [vmem:[#allocation4 + $0xb8] sm:$0xff]  }
  0x38   :  { %220 = vmatpush1.bf16.msra.mxu1 %v896_v13  ;;  %251 = vmatprep.mubr.bf16.mxu1 %v1002_v0 }
  0x39   :  { %221 = vmatprep.subr.bf16.mxu1 %v901_v16  ;;  %809 = vmatpush3.bf16.msra.mxu0 %v915_v23  ;;  %v941_v23 = vld [vmem:[%s1124_s5 + $0x8] sm:$0xff]  }
  0x3a   :  { %810 = vmatprep.subr.bf16.mxu0 %v916_v24  ;;  %v942_v24 = vld [vmem:[%s1124_s5 + $0x10] sm:$0xff]  }
  0x3c   :  { %222 = vmatpush1.bf16.msra.mxu1 %v899_v18 }
  0x3d   :  { %223 = vmatprep.subr.bf16.mxu1 %v904_v21  ;;  %811 = vmatpush3.bf16.msra.mxu0 %v918_v28  ;;  %v946_v28 = vld [vmem:[%s1124_s5 + $0x30] sm:$0xff]  }
  0x3e   :  { %812 = vmatprep.subr.bf16.mxu0 %v920_v29  ;;  %v947_v29 = vld [vmem:[%s1124_s5 + $0x38] sm:$0xff]  }
  0x40   :  { %224 = vmatpush1.bf16.msra.mxu1 %v902_v22 }
  0x41   :  { %225 = vmatprep.subr.bf16.mxu1 %v907_v25  ;;  %813 = vmatpush3.bf16.msra.mxu0 %v922_v30  ;;  %v943_v25 = vld [vmem:[%s1124_s5 + $0x18] sm:$0xff]  }
  0x42   :  { %814 = vmatprep.subr.bf16.mxu0 %v924_v34 }
  0x44   :  { %226 = vmatpush1.bf16.msra.mxu1 %v905_v26  ;;  %v944_v26 = vld [vmem:[%s1124_s5 + $0x20] sm:$0xff]  }
  0x45   :  { %824 = vmatprep.subr.bf16.mxu1 %v917_v27  ;;  %815 = vmatpush3.bf16.msra.mxu0 %v926_v36  ;;  %v945_v27 = vld [vmem:[%s1124_s5 + $0x28] sm:$0xff]  }
  0x46   :  { %816 = vmatprep.subr.bf16.mxu0 %v928_v38 }
  0x47   :  { %759 = vmatmul.mubr.msk.bf16.vlgmr.msra.gmra.mrb[4].mxu1 %vm174_vm0, %v55_v12 }
  0x48   :  { %825 = vmatpush3.bf16.msra.mxu1 %v919_v31 }
  0x49   :  { %826 = vmatprep.subr.bf16.mxu1 %v921_v32  ;;  %817 = vmatpush3.bf16.msra.mxu0 %v930_v40 }
  0x4a   :  { %855 = vmatprep.subr.bf16.mxu0 %v1003_v50 }
  0x4c   :  { %827 = vmatpush3.bf16.msra.mxu1 %v923_v33 }
  0x4d   :  { %828 = vmatprep.subr.bf16.mxu1 %v925_v35  ;;  %v760_v35 = vld [vmem:[%s1123_s4] ss:$0 sm:$0xff] }
  0x50   :  { %829 = vmatpush3.bf16.msra.mxu1 %v927_v37 }
  0x51   :  { %830 = vmatprep.subr.bf16.mxu1 %v929_v39 }
  0x54   :  { %831 = vmatpush3.bf16.msra.mxu1 %v931_v41 }
  0x55   :  { %832 = vmatprep.subr.bf16.mxu1 %v932_v42 }
  0x58   :  { %833 = vmatpush3.bf16.msra.mxu1 %v933_v43 }
  0x59   :  { %834 = vmatprep.subr.bf16.mxu1 %v934_v44 }
  0x5c   :  { %835 = vmatpush3.bf16.msra.mxu1 %v935_v45 }
  0x5d   :  { %836 = vmatprep.subr.bf16.mxu1 %v936_v46  ;;  %v793_v46 = vld [vmem:[%s1125_s6] ss:$0 sm:$0xff] }
  0x60   :  { %837 = vmatpush3.bf16.msra.mxu1 %v937_v47 }
  0x61   :  { %838 = vmatprep.subr.bf16.mxu1 %v938_v48 }
  0x64   :  { %839 = vmatpush3.bf16.msra.mxu1 %v939_v49 }
 0x10a   :  { %v212_v58 = vpop.f32.mrb[0].mxu1 }
 0x10b   :  { %v213_v59 = vadd.f32 %v212_v58, %v77_v56  ;;  %v214_v60 = vpop.f32.mrb[1].mxu1 }
 0x10c   :  { %v215_v61 = vadd.f32 %v214_v60, %v81_v57  ;;  %v216_v62 = vpop.f32.mrb[2].mxu1 }
 0x10d   :  { %vm260_vm1 = vcmp.gt.f32.partialorder %v213_v59, 0.0  ;;  %v264_v63 = vmul.f32 0.01, %v213_v59  ;;  %v217_v0 = vpop.f32.mrb[3].mxu1 }
 0x10e   :  { %vm261_vm2 = vcmp.gt.f32.partialorder %v215_v61, 0.0  ;;  %v265_v1 = vmul.f32 0.01, %v215_v61 }
 0x10f   :  { %v268_v2 = vsel %vm260_vm1, %v213_v59, %v264_v63 }
 0x110   :  { %v269_v3 = vsel %vm261_vm2, %v215_v61, %v265_v1  ;;  %v272_v6 = vpack.c.bf16 %v268_v2, %v268_v2 }
 0x111   :  { %v273_v4 = vpack.c.bf16 %v269_v3, %v269_v3 }
 0x113   :  { %571 = vmatprep.mubr.bf16.mxu0 %v273_v4 }
 0x114   :  { %572 = vmatmul.mubr.bf16.vlgmr.msra.gmra.mrb[0].mxu0 %v272_v6 }
 0x115   :  { %856 = vmatpush3.bf16.msra.mxu0 %v940_v5  ;;  %871 = vmatprep.mubr.msk.bf16.mxu0 %vm1004_vm5, %v1003_v50 }
 0x116   :  { %857 = vmatprep.subr.bf16.mxu0 %v1003_v50 }
 0x119   :  { %858 = vmatpush3.bf16.msra.mxu0 %v941_v23 }
 0x11a   :  { %v253_v11 = vpop.f32.mrb[4].mxu1  ;;  %859 = vmatprep.subr.bf16.mxu0 %v1003_v50 }
 0x11b   :  { %v254_v12 = vadd.f32 %v253_v11, %v85_v9  ;;  %v255_v13 = vpop.f32.mrb[5].mxu1 }
 0x11c   :  { %v256_v14 = vadd.f32 %v255_v13, %v89_v10  ;;  %v257_v15 = vpop.f32.mrb[6].mxu1 }
 0x11d   :  { %vm262_vm3 = vcmp.gt.f32.partialorder %v254_v12, 0.0  ;;  %v266_v16 = vmul.f32 0.01, %v254_v12  ;;  %v258_v17 = vpop.f32.mrb[7].mxu1  ;;  %860 = vmatpush3.bf16.msra.mxu0 %v942_v24 }
 0x11e   :  { %vm263_vm4 = vcmp.gt.f32.partialorder %v256_v14, 0.0  ;;  %v267_v18 = vmul.f32 0.01, %v256_v14  ;;  %861 = vmatprep.subr.bf16.mxu0 %v1003_v50 }
 0x11f   :  { %v270_v19 = vsel %vm262_vm3, %v254_v12, %v266_v16 }
 0x120   :  { %v271_v20 = vsel %vm263_vm4, %v256_v14, %v267_v18  ;;  %v274_v22 = vpack.c.bf16 %v270_v19, %v270_v19 }
 0x121   :  { %v275_v21 = vpack.c.bf16 %v271_v20, %v271_v20  ;;  %862 = vmatpush3.bf16.msra.mxu0 %v943_v25 }
 0x122   :  { %863 = vmatprep.subr.bf16.mxu0 %v1003_v50 }
 0x123   :  { %611 = vmatprep.mubr.bf16.mxu1 %v275_v21 }
 0x124   :  { %612 = vmatmul.mubr.bf16.vlgmr.msra.gmra.mrb[8].mxu1 %v274_v22 }
 0x125   :  { %864 = vmatpush3.bf16.msra.mxu0 %v944_v26 }
 0x126   :  { %865 = vmatprep.subr.bf16.mxu0 %v1003_v50 }
 0x129   :  { %866 = vmatpush3.bf16.msra.mxu0 %v945_v27 }
 0x12a   :  { %867 = vmatprep.subr.bf16.mxu0 %v1003_v50 }
 0x12d   :  { %868 = vmatpush3.bf16.msra.mxu0 %v946_v28 }
 0x12e   :  { %869 = vmatprep.subr.bf16.mxu0 %v1003_v50 }
 0x131   :  { %870 = vmatpush3.bf16.msra.mxu0 %v947_v29 }
 0x1e7   :  { %v818_v30 = vpop.f32.mrb[0].mxu0 }
 0x1e8   :  { %v819_v31 = vpop.f32.mrb[1].mxu0 }
 0x1e9   :  { %v820_v32 = vadd.f32 %v819_v31, %v818_v30  ;;  %v821_v33 = vpop.f32.mrb[2].mxu0 }
 0x1ea   :  { %v822_v34 = vpop.f32.mrb[3].mxu0 }
 0x1eb   :  { %v574_v38 = vadd.f32 %v820_v32, %v760_v35 }
 0x1f7   :  { %v840_v36 = vpop.f32.mrb[8].mxu1 }
 0x1f8   :  { %v841_v37 = vpop.f32.mrb[9].mxu1 }
 0x1f9   :  { %v842_v39 = vadd.f32 %v841_v37, %v840_v36  ;;  %v843_v40 = vpop.f32.mrb[10].mxu1 }
 0x1fa   :  { %v844_v41 = vpop.f32.mrb[11].mxu1 }
 0x1fb   :  { %v614_v42 = vadd.f32 %v842_v39, %v574_v38 }
 0x1fd   :  { %vm619_vm6 = vcmp.gt.f32.partialorder %v614_v42, 0.0  ;;  %v620_v43 = vmul.f32 0.01, %v614_v42 }
 0x1ff   :  { %v621_v44 = vsel %vm619_vm6, %v614_v42, %v620_v43 }
 0x200   :  { %v622_v45 = vpack.c.bf16 %v621_v44, %v621_v44 }
 0x202   :  { %872 = vmatmul.mubr.bf16.vlgmr.msra.gmra.mrb[4].mxu0 %v622_v45 }
 0x2d5   :  { %v728_v47 = vpop.f32.mrb[4].mxu0 }
 0x2d6   :  { %v729_v48 = vadd.f32 %v793_v46, %v728_v47  ;;  %v873_v49 = vpop.f32.mrb[5].mxu0 }
 0x2d7   :  { %v731_v50 = vpop.f32.mrb[6].mxu0 }
 0x2d8   :  { %735 = vst.msk [vmem:[%s1126_s7] sm:$0xff] %vm734_vm7, %v729_v48  ;;  %v874_v51 = vpop.f32.mrb[7].mxu0 }
 0x2d9   :  { %740 = vsyncpa [#allocation3], 1 }
 0x2da   :  { %741 = vsyncpa [#allocation5], 1 }

</bundles_post_ra>
